<compile_context>
chip_gen: v7x
topology: tpu7x:2x2x1
jax: 0.10.0
libtpu: 0.0.40
codegen_flags: <defaults>
</compile_context>

<pallas_src>
from functools import lru_cache

import numpy as np
import jax
import jax.numpy as jnp
from jax.experimental import pallas as pl
from jax.experimental.pallas import tpu as pltpu

K = 64  # module-level `k` in DMPN.py

_VMEM_LIMIT = 32 * 1024 * 1024       # explicit scoped-VMEM limit (safe on v5e/v6e/v7x)
_IN_BUDGET_BYTES = 8 * 1024 * 1024   # budget for the double-buffered x block


# ---------------------------------------------------------------------------
# Bilinear (align_corners=True) interpolation matrix, cached on host.
# ---------------------------------------------------------------------------
@lru_cache(maxsize=None)
def _interp_matrix_np(n_out, n_in):
    if n_out == 1:
        src = np.zeros((1,), np.float32)
    else:
        src = np.arange(n_out, dtype=np.float32) * (n_in - 1) / (n_out - 1)
    i0 = np.clip(np.floor(src).astype(np.int32), 0, n_in - 1)
    i1 = np.clip(i0 + 1, 0, n_in - 1)
    frac = (src - i0).astype(np.float32)
    A = np.zeros((n_out, n_in), np.float32)
    A[np.arange(n_out), i0] += 1.0 - frac
    A[np.arange(n_out), i1] += frac
    return A


# ---------------------------------------------------------------------------
# Kernel 1: 1x1 conv only (x_size is None).
#   w_ref: (C, 1)        VMEM
#   b_ref: (1,)          SMEM
#   x_ref: (Nb, C, T)    VMEM   (T = lane-dense spatial tile, multiple of 128)
#   o_ref: (Nb, 1, T)    VMEM
# Channel reduction on VPU/XLU (sublane-axis sum); MXU stays idle, kernel is
# purely DMA-bound.
# ---------------------------------------------------------------------------
def _conv1x1_kernel(w_ref, b_ref, x_ref, o_ref):
    x = x_ref[...].astype(jnp.float32)
    w = w_ref[...].astype(jnp.float32)          # (C, 1)
    o_ref[...] = jnp.sum(x * w[None, :, :], axis=1, keepdims=True) + b_ref[0]


# ---------------------------------------------------------------------------
# Kernel 2: fused 1x1 conv + bilinear resize (single pallas_call, no HBM
# round-trip of the conv output).
#   w_ref:   (Ct, 1)           VMEM   channel tile of the conv weight
#   b_ref:   (1,)              SMEM
#   ah_ref:  (H_out, H)        VMEM
#   awt_ref: (W, W_out)        VMEM
#   x_ref:   (Nb, Ct, H, W)    VMEM
#   o_ref:   (Nb, H_out, W_out) VMEM
#   y_acc:   (Nb, H, W) f32    VMEM scratch (conv accumulator across C tiles)
# grid = (batch_blocks, C // Ct);  C axis is "arbitrary" (accumulation).
# ---------------------------------------------------------------------------
def _fused_kernel(w_ref, b_ref, ah_ref, awt_ref, x_ref, o_ref, y_acc):
    ci = pl.program_id(1)

    @pl.when(ci == 0)
    def _init():
        y_acc[...] = jnp.zeros_like(y_acc)

    x = x_ref[...].astype(jnp.float32)          # (Nb, Ct, H, W)
    w = w_ref[...].astype(jnp.float32)          # (Ct, 1)
    y_acc[...] += jnp.sum(x * w[None, :, :, None], axis=1)   # (Nb, H, W)

    @pl.when(ci == pl.num_programs(1) - 1)
    def _finalize():
        y = y_acc[...] + b_ref[0]               # (Nb, H, W)
        ah = ah_ref[...]                        # (H_out, H)
        awt = awt_ref[...]                      # (W, W_out)
        for bb in range(y.shape[0]):            # small static unroll over Nb
            t = jnp.dot(ah, y[bb], preferred_element_type=jnp.float32)
            o_ref[bb, :, :] = jnp.dot(t, awt, preferred_element_type=jnp.float32)


# ---------------------------------------------------------------------------
# Wrappers
# ---------------------------------------------------------------------------
def _score_conv(x, w2d, b):
    N, C, H, W = x.shape
    HW = H * W
    itemsize = x.dtype.itemsize
    x_flat = x.reshape(N, C, HW)

    # Lane-dense spatial tile: multiple of 128, bounded by the VMEM budget.
    if HW >= 128:
        t_budget = max(128, (_IN_BUDGET_BYTES // (2 * C * itemsize)) // 128 * 128)
        T = min(t_budget, (HW // 128) * 128)
    else:
        T = HW                                   # full-extent block for tiny maps
    n_hw = pl.cdiv(HW, T)

    # Fold batches into one block when spatial tiles are small, but keep >= 2
    # parallel blocks when N > 1 so v7x's second TensorCore stays busy.
    nb = max(1, _IN_BUDGET_BYTES // (2 * C * T * itemsize))
    nb = min(N, nb)
    if n_hw == 1 and N > 1:
        nb = min(nb, -(-N // 2))
    n_b = pl.cdiv(N, nb)

    out = pl.pallas_call(
        _conv1x1_kernel,
        out_shape=jax.ShapeDtypeStruct((N, 1, HW), jnp.float32),
        grid=(n_b, n_hw),
        in_specs=[
            pl.BlockSpec((C, 1), lambda bi, si: (0, 0)),
            pl.BlockSpec(memory_space=pltpu.MemorySpace.SMEM),
            pl.BlockSpec((nb, C, T), lambda bi, si: (bi, 0, si)),
        ],
        out_specs=pl.BlockSpec((nb, 1, T), lambda bi, si: (bi, 0, si)),
        compiler_params=pltpu.CompilerParams(
            dimension_semantics=("parallel", "parallel"),
            vmem_limit_bytes=_VMEM_LIMIT),
    )(w2d, b, x_flat)
    return out.reshape(N, 1, H, W)


def _choose_channel_tile(C, plane_bytes, budget):
    """Largest divisor of C (multiple of 8, or C itself) fitting the budget."""
    cands = [d for d in range(C, 0, -1)
             if C % d == 0 and (d == C or d % 8 == 0)]
    for d in cands:
        if 2 * d * plane_bytes <= budget:
            return d
    return cands[-1]


def _score_conv_resize(x, w2d, b, H_out, W_out):
    N, C, H, W = x.shape
    itemsize = x.dtype.itemsize

    A_h = jnp.asarray(_interp_matrix_np(H_out, H))        # (H_out, H)
    A_wT = jnp.asarray(_interp_matrix_np(W_out, W).T)     # (W, W_out)

    plane = H * W * itemsize
    ct = _choose_channel_tile(C, plane, _IN_BUDGET_BYTES)
    n_c = C // ct

    nb = max(1, _IN_BUDGET_BYTES // (2 * ct * plane))
    nb = min(N, nb)
    if N > 1:
        nb = min(nb, -(-N // 2))                 # keep >= 2 batch blocks (v7x)
    n_b = pl.cdiv(N, nb)

    out = pl.pallas_call(
        _fused_kernel,
        out_shape=jax.ShapeDtypeStruct((N, H_out, W_out), jnp.float32),
        grid=(n_b, n_c),
        in_specs=[
            pl.BlockSpec((ct, 1), lambda bi, ci: (ci, 0)),
            pl.BlockSpec(memory_space=pltpu.MemorySpace.SMEM),
            pl.BlockSpec((H_out, H), lambda bi, ci: (0, 0)),
            pl.BlockSpec((W, W_out), lambda bi, ci: (0, 0)),
            pl.BlockSpec((nb, ct, H, W), lambda bi, ci: (bi, ci, 0, 0)),
        ],
        out_specs=pl.BlockSpec((nb, H_out, W_out), lambda bi, ci: (bi, 0, 0)),
        scratch_shapes=[pltpu.VMEM((nb, H, W), jnp.float32)],
        compiler_params=pltpu.CompilerParams(
            dimension_semantics=("parallel", "arbitrary"),
            vmem_limit_bytes=_VMEM_LIMIT),
    )(w2d, b, A_h, A_wT, x)
    return out.reshape(N, 1, H_out, W_out)


def score_layer(x, weight, bias, x_size=None):
    """x: (N, C, H, W) float32 or bfloat16; weight: (1, C, 1, 1); bias: (1,)."""
    N, C, H, W = x.shape
    w2d = weight.reshape(C, 1).astype(jnp.float32)
    b = bias.reshape(1).astype(jnp.float32)
    if x_size is None:
        return _score_conv(x, w2d, b)
    H_out, W_out = int(x_size[2]), int(x_size[3])
    return _score_conv_resize(x, w2d, b, H_out, W_out)


if __name__ == "__main__":
    key = jax.random.PRNGKey(0)
    k_x, k_w, k_b = jax.random.split(key, 3)

    N, C, H, W = 2, K, 16, 16
    x = jax.random.normal(k_x, (N, C, H, W), dtype=jnp.float32)
    # Conv2d(k, 1, 1, 1) parameters: weight (1, k, 1, 1), bias (1,)
    weight = jax.random.normal(k_w, (1, C, 1, 1), dtype=jnp.float32) * 0.1
    bias = jax.random.normal(k_b, (1,), dtype=jnp.float32) * 0.1

    # Path 1: no x_size (just the 1x1 conv)
    out1 = score_layer(x, weight, bias, x_size=None)
    jax.block_until_ready(out1)

    # Path 2: with x_size -> fused conv + bilinear (align_corners=True) to 32x32
    x_size = (N, 1, 32, 32)
    out2 = score_layer(x, weight, bias, x_size=x_size)
    jax.block_until_ready(out2)

    # Path 3: bf16 activations (halved HBM read traffic), looser tolerance.
    out2_bf16 = score_layer(x.astype(jnp.bfloat16), weight, bias, x_size=x_size)
    jax.block_until_ready(out2_bf16)

    # Pure-JAX reference check
    ref1 = (jnp.einsum("nchw,oc->nohw", x, weight.reshape(1, C))
            + bias.reshape(1, 1, 1, 1))
    A_h = jnp.asarray(_interp_matrix_np(32, H))
    A_w = jnp.asarray(_interp_matrix_np(32, W))
    ref2 = jnp.einsum("oh,nhw,pw->nop", A_h, ref1[:, 0], A_w)[:, None]

    assert out1.shape == (N, 1, H, W)
    assert out2.shape == (N, 1, 32, 32)
    assert jnp.allclose(out1, ref1, atol=1e-4, rtol=1e-4)
    assert jnp.allclose(out2, ref2, atol=1e-4, rtol=1e-4)
    assert jnp.allclose(out2_bf16, ref2, atol=5e-2, rtol=5e-2)

    print("KERNEL_OK")
</pallas_src>

<mosaic_0001>
module attributes {stable_mosaic.version = 11 : i64} {
  func.func @_conv1x1_kernel(%arg0: i32, %arg1: i32, %arg2: memref<64x1xf32, #tpu.memory_space<vmem>>, %arg3: memref<1xf32, #tpu.memory_space<smem>>, %arg4: memref<1x64x256xf32, #tpu.memory_space<vmem>>, %arg5: memref<1x1x256xf32, #tpu.memory_space<vmem>>) attributes {dimension_semantics = [#tpu.dimension_semantics<parallel>, #tpu.dimension_semantics<parallel>], iteration_bounds = array<i64: 2, 1>, scalar_prefetch = 0 : i64, scratch_operands = 0 : i64, tpu.core_type = #tpu.core_type<tc>, window_params = [{pipeline_mode = #tpu.pipeline_mode<synchronous>, transform_indices = @transform_0, window_bounds = array<i64: 64, 1>}, {transform_indices = @transform_1, window_bounds = array<i64: 1>}, {transform_indices = @transform_2, window_bounds = array<i64: 1, 64, 256>}, {transform_indices = @transform_3, window_bounds = array<i64: 1, 1, 256>}]} {
    %c0 = arith.constant 0 : index
    %c0_0 = arith.constant 0 : index
    %c0_1 = arith.constant 0 : index
    %0 = vector.load %arg4[%c0, %c0_0, %c0_1] : memref<1x64x256xf32, #tpu.memory_space<vmem>>, vector<1x64x256xf32>
    %c0_2 = arith.constant 0 : index
    %c0_3 = arith.constant 0 : index
    %1 = vector.load %arg2[%c0_2, %c0_3] : memref<64x1xf32, #tpu.memory_space<vmem>>, vector<64x1xf32>
    %2 = vector.shape_cast %1 : vector<64x1xf32> to vector<1x64x1xf32>
    %3 = vector.broadcast %2 : vector<1x64x1xf32> to vector<1x64x256xf32>
    %4 = arith.mulf %0, %3 : vector<1x64x256xf32>
    %cst = arith.constant dense<0.000000e+00> : vector<1x256xf32>
    %5 = vector.multi_reduction <add>, %4, %cst [1] : vector<1x64x256xf32> to vector<1x256xf32>
    %6 = vector.shape_cast %5 : vector<1x256xf32> to vector<1x1x256xf32>
    %c0_4 = arith.constant 0 : index
    %7 = memref.load %arg3[%c0_4] : memref<1xf32, #tpu.memory_space<smem>>
    %8 = vector.broadcast %7 : f32 to vector<1x1x256xf32>
    %9 = arith.addf %6, %8 : vector<1x1x256xf32>
    %c0_5 = arith.constant 0 : index
    %c0_6 = arith.constant 0 : index
    %c0_7 = arith.constant 0 : index
    %10 = vector.load %arg5[%c0_5, %c0_6, %c0_7] : memref<1x1x256xf32, #tpu.memory_space<vmem>>, vector<1x1x256xf32>
    tpu.vector_store %arg5[%c0_5, %c0_6, %c0_7], %9 {strides = array<i32>} : memref<1x1x256xf32, #tpu.memory_space<vmem>>, vector<1x1x256xf32>,
    return
  }
  func.func @transform_0(%arg0: i32, %arg1: i32) -> (i32, i32) {
    %c0_i32 = arith.constant 0 : i32
    %c0_i32_0 = arith.constant 0 : i32
    %c0_i32_1 = arith.constant 0 : i32
    return %c0_i32, %c0_i32_0 : i32, i32
  }
  func.func @transform_1(%arg0: i32, %arg1: i32) -> i32 {
    %c0_i32 = arith.constant 0 : i32
    %c0_i32_0 = arith.constant 0 : i32
    return %c0_i32 : i32
  }
  func.func @transform_2(%arg0: i32, %arg1: i32) -> (i32, i32, i32) {
    %c0_i32 = arith.constant 0 : i32
    %c0_i32_0 = arith.constant 0 : i32
    return %arg0, %c0_i32, %arg1 : i32, i32, i32
  }
  func.func @transform_3(%arg0: i32, %arg1: i32) -> (i32, i32, i32) {
    %c0_i32 = arith.constant 0 : i32
    %c0_i32_0 = arith.constant 0 : i32
    return %arg0, %c0_i32, %arg1 : i32, i32, i32
  }
}

</mosaic_0001>

<bundles_post_ra>
// kernel: tpu_custom_call.1
= control target key start
LH: loop header
LB: loop body
LE: loop exit
PB: predicated region body
PF: predicated region fallthrough
CT: control target
= control target key end

     0   :  { %s888_s0 = inlined_call_operand.vmem [shape: f32[64,1], index: 0, kind: input, shape index: {}]   ;;  %s889_s1 = inlined_call_operand.<no memory space> [shape: f32[1], index: 1, kind: input, shape index: {}]   ;;  %s890_s2 = inlined_call_operand.hbm [shape: f32[2,64,256], index: 2, kind: input, shape index: {}]   ;;  %s891_s3 = inlined_call_operand.hbm [shape: f32[2,1,256], index: 3, kind: output, shape index: {}]  }
   0x1   :  { %8 = sst [smem:[#allocation2]] %s889_s1 }
   0x2   :  { %9 = vsyncpa [#allocation4], 0 }
   0x3   :  { %11 = vsyncpa [#allocation4 + $0x1], 0 }
   0x4   :  { %12 = vsyncpa [#allocation5], 0 }
   0x5   :  { %14 = vsyncpa [#allocation5 + $0x1], 0  ;;  %s672_s14 = smov 0   ;;  %s674_s15 = smov 0  }
   0x6   :  { %s676_s16 = smov 0   ;;  %s678_s17 = smov 0  }
   0x7   :  { %s680_s18 = smov 0   ;;  %s682_s19 = smov 0  }
   0x8 LB: > { %s444_s1 = sadd.s32 4294967295, %s641_s19   ;;  %s445_s20 = sadd.s32 4294967294, %s641_s19   ;;  %s641_s19 = sphi %s682_s19, %s20_s19   ;;  %s637_s18 = sphi %s680_s18, %s906_s18   ;;  %s633_s17 = sphi %s678_s17, %s905_s17   ;;  %s629_s16 = sphi %s676_s16, %s904_s16   ;;  %s625_s15 = sphi %s674_s15, %s903_s15   ;;  %s621_s14 = sphi %s672_s14, %s902_s14  }
   0x9   : > { %s32_s21 = sadd.s32 1, %s637_s18  ;;  %s83_s22 = sadd.s32 1, %s629_s16 }
   0xa   : > { %p34_p0 = scmp.ge.s32.totalorder %s32_s21, 2  ;;  %p90_p1 = scmp.ne.s32.totalorder %s629_s16, %s625_s15 }
   0xb   : > { %p91_p2 = scmp.eq.s32.totalorder %s641_s19, 0  ;;  %p96_p3 = scmp.ne.s32.totalorder %s625_s15, %s621_s14 }
   0xc   : > { %s908_s21 = smov (%p34_p0, %s32_s21), 0  ;;  %p97_p5 = scmp.eq.s32.totalorder %s444_s1, 0 }
   0xd   : > { %p713_p4 = por %p91_p2, %p90_p1  ;;  %s78_s24 = ssub.s32 %s637_s18, %s908_s21 }
   0xe   : > { %p122_p6 = scmp.eq.s32.totalorder %s444_s1, 1  ;;  %p81_p7 = scmp.eq.s32.totalorder %s78_s24, 0 }
   0xf   : > { %p719_p8 = por %p97_p5, %p96_p3  ;;  %p128_p10 = scmp.eq.s32.totalorder %s445_s20, 1 }
  0x10   : > { %p723_p9 = por %p122_p6, %p90_p1  ;;  %p473_p13 = scmp.lt.s32.totalorder %s641_s19, 2 }
  0x11   : > { %s728_s27 = scalar_select %p81_p7, %s629_s16, %s83_s22  }
  0x12   : > { %s895_s26 = scalar_select %p723_p9, 1, 0 }
  0x13   : > { %p730_p11 = por %p128_p10, %p96_p3  ;;  %s154_s29 = sand.u32 1, %s629_s16  }
  0x14   : > { %s448_s30 = sshll.u32 %s154_s29, 7  ;;  %s459_s4 = sshll.u32 %s637_s18, 11 }
  0x15   : > { %s896_s28 = scalar_select %p730_p11, 1, 0 }
  0x16   : > { %s741_s7 = scalar_lea.hbm %s890_s2, %s459_s4  ;;  %s158_s8 = scalar_lea.vmem [#allocation3], %s448_s30 }
  0x17   : > { %s167_s9 = sshll.u32 %s158_s8, 4  ;;  %p747_p0 = pnand %p473_p13, %p713_p4  ;;  %s743_s9 = int_to_ptr.vmem [resolvable:$true] %s167_s9 }
  0x18   : > { %s752_s11 = scalar_lea.sflag [#allocation4], %s154_s29  ;;  %s529_s12 = scalar_lea.hbm %s741_s7, 2048 }
  0x19   : > { %p530_p2 = scmp.ne.s32.totalorder %s741_s7, %s529_s12  ;;  %p531_p3 = pneg %p747_p0 }
  0x1a   : > { %s534_s20 = scalar_lea.hbm %s890_s2, 4096  ;;  %p535_p4 = scmp.lt.u32.totalorder %s741_s7, %s890_s2 }
  0x1b   : > { %p532_p5 = pnand %p531_p3, %p530_p2  ;;  %p536_p7 = scmp.lt.u32.totalorder %s534_s20, %s529_s12 }
  0x1c   : > { %p538_p13 = scmp.lt.u32.totalorder %s529_s12, %s741_s7 }
  0x1d   : > { %p533_p6 = pneg %p532_p5  ;;  %p537_p10 = por %p536_p7, %p535_p4 }
  0x1f   : > { %p539_p12 = por %p538_p13, %p537_p10 }
  0x21   : > { %p540_p1 = pnand %p539_p12, %p533_p6 }
  0x23   : > { %543 = shalt.err (!%p540_p1)
}
  0x24   : > { %s544_s24 = scalar_lea.vmem %s743_s9, 2048  ;;  %s643_s29 = smov [#allocation3]  }
  0x25   : > { %p545_p2 = scmp.ne.s32.totalorder %s743_s9, %s544_s24  ;;  %s549_s30 = sshll.u32 %s643_s29, 4  ;;  %s550_s30 = int_to_ptr.vmem [resolvable:$false] %s549_s30 }
  0x26   : > { %s551_s4 = scalar_lea.vmem %s550_s30, 4096  ;;  %p552_p9 = scmp.lt.s32.totalorder %s743_s9, %s550_s30 }
  0x27   : > { %p547_p5 = pnand %p545_p2, %p531_p3  ;;  %p553_p4 = scmp.lt.s32.totalorder %s551_s4, %s544_s24 }
  0x29   : > { %p548_p11 = pneg %p547_p5  ;;  %p554_p7 = por %p553_p4, %p552_p9 }
  0x2b   : > { %p555_p10 = pnand %p554_p7, %p548_p11 }
  0x2d   : > { %558 = shalt.err (!%p555_p10)
}
  0x2e   : > { %s644_s5 = smov 256   ;;  %s645_s6 = smov 16  }
  0x2f   : > { %468 = dma.hbm_to_vmem [thread:$0]  (!%p747_p0), %s741_s7, 2048, %s743_s9, %s752_s11, %s644_s5, %s644_s5, %s645_s6  }
  0x30   : > { %p175_p12 = scmp.lt.s32.totalorder %s641_s19, 3  ;;  %p898_p1 = scmp.ge.s32.totalorder %s641_s19, 1 }
  0x32   : > { %p176_p3 = pnand %p898_p1, %p175_p12 }
  0x33   : > { %s784_s8 = sand.u32 (!%p176_p3), 1, %s625_s15  }
  0x34   : > { %179 = sbr.rel (%p176_p3) target bundleno = 244 (0xf4), region = 32  ;;  %s452_s12 = sshll.u32 (!%p176_p3), %s784_s8, 7 }
  0x35   : > { %s182_s13 = scalar_lea.sflag (!%p176_p3), [#allocation4], %s784_s8  ;;  %s788_s1 = scalar_lea.vmem (!%p176_p3), [#allocation3], %s452_s12 }
  0x3b   : > { %612 = dma.done.wait (%p719_p8), %s182_s13, 2048  }
  0x3c   : > { %614 = vsyncadd (%p719_p8), %s182_s13, 4294965248  ;;  %v646_v0 = vmov 0   ;;  %v228_v1 = vld [vmem:[%s888_s0 + $0x10] sm:$0xff]  ;;  %v226_v2 = vld [vmem:[%s888_s0] sm:$0xff]  ;;  %s316_s7 = sld [smem:[#allocation2]]  ;;  %s460_s9 = sshll.u32 %s633_s17, 5 }
  0x3d   : > { %528 = vset.pattern.permute.xlu1 %v646_v0  ;;  %527 = vset.pattern.permute.xlu0 %v646_v0  ;;  %v229_v3 = vld [vmem:[%s888_s0 + $0x18] sm:$0xff]  ;;  %v227_v4 = vld [vmem:[%s888_s0 + $0x8] sm:$0xff]  ;;  %v230_v6 = vld [vmem:[%s888_s0 + $0x20] sm:$0xff]  ;;  %s839_s25 = scalar_lea.hbm %s891_s3, %s460_s9  ;;  %s344_s23 = scalar_lea.sflag [#allocation5], %s784_s8 }
  0x3e   : > { %246 = vperm.xlu1 %528, %v228_v1   ;;  %236 = vperm.xlu0 %527, %v226_v2   ;;  %v231_v5 = vld [vmem:[%s888_s0 + $0x28] sm:$0xff]  ;;  %v233_v7 = vld [vmem:[%s888_s0 + $0x38] sm:$0xff]  ;;  %v232_v8 = vld [vmem:[%s888_s0 + $0x30] sm:$0xff]  ;;  %p899_p9 = scmp.ne.s32.totalorder %s895_s26, 0  ;;  %s648_s17 = smov [#allocation6]  }
  0x3f   : > { %v210_v11 = vld [vmem:[%s788_s1] sm:$0xff]  ;;  %v211_v12 = vld [vmem:[%s788_s1 + $0x8] sm:$0xff]  ;;  %v212_v13 = vld [vmem:[%s788_s1 + $0x10] sm:$0xff]  ;;  %s563_s29 = sshll.u32 %s648_s17, 4  ;;  %s564_s29 = int_to_ptr.vmem [resolvable:$false] %s563_s29 }
  0x40   : > { %v213_v14 = vld [vmem:[%s788_s1 + $0x18] sm:$0xff]  ;;  %v214_v15 = vld [vmem:[%s788_s1 + $0x20] sm:$0xff]  ;;  %v215_v16 = vld [vmem:[%s788_s1 + $0x28] sm:$0xff]  ;;  %s565_s30 = scalar_lea.vmem %s564_s29, 64 }
  0x41   : > { %v216_v23 = vld [vmem:[%s788_s1 + $0x30] sm:$0xff]  ;;  %v217_v24 = vld [vmem:[%s788_s1 + $0x38] sm:$0xff]  ;;  %v218_v31 = vld [vmem:[%s788_s1 + $0x40] sm:$0xff] }
  0x42   : > { %251 = vperm.xlu1 %528, %v229_v3   ;;  %241 = vperm.xlu0 %527, %v227_v4   ;;  %v219_v32 = vld [vmem:[%s788_s1 + $0x48] sm:$0xff]  ;;  %v220_v37 = vld [vmem:[%s788_s1 + $0x50] sm:$0xff]  ;;  %v221_v38 = vld [vmem:[%s788_s1 + $0x58] sm:$0xff] }
  0x43   : > { %v222_v44 = vld [vmem:[%s788_s1 + $0x60] sm:$0xff]  ;;  %v223_v45 = vld [vmem:[%s788_s1 + $0x68] sm:$0xff]  ;;  %v224_v51 = vld [vmem:[%s788_s1 + $0x70] sm:$0xff] }
  0x44   : > { %v225_v52 = vld [vmem:[%s788_s1 + $0x78] sm:$0xff]  ;;  %s453_s1 = sshll.u32 %s784_s8, 1 }
  0x45   : > { %s207_s10 = scalar_lea.vmem [#allocation6], %s453_s1 }
  0x46   : > { %261 = vperm.xlu1 %528, %v231_v5   ;;  %256 = vperm.xlu0 %527, %v230_v6   ;;  %v647_v5 = vmov 1966171168   ;;  %s360_s11 = sshll.u32 %s207_s10, 4  ;;  %s841_s11 = int_to_ptr.vmem [resolvable:$true] %s360_s11 }
  0x47   : > { %v324_v6 = vunpack.c.l.s4 %v647_v5  ;;  %s559_s24 = scalar_lea.vmem %s841_s11, 32  ;;  %p566_p6 = scmp.lt.s32.totalorder %s841_s11, %s564_s29 }
  0x48   : > { %p560_p8 = scmp.ne.s32.totalorder %s841_s11, %s559_s24  ;;  %p567_p13 = scmp.lt.s32.totalorder %s565_s30, %s559_s24 }
  0x4a   : > { %271 = vperm.xlu1 %528, %v233_v7   ;;  %266 = vperm.xlu0 %527, %v232_v8   ;;  %v326_v7 = vlaneseq  ;;  %p561_p11 = pnand %p560_p8, %p899_p9  ;;  %p568_p2 = por %p567_p13, %p566_p6 }
  0x4c   : > { %vm340_vm0 = vcmp.lt.s32.totalorder %v326_v7, 256  ;;  %p562_p0 = pneg %p561_p11 }
  0x4e   : > { %p569_p5 = pnand %p568_p2, %p562_p0 }
  0xbd   : > { %v247_v9 = vpop.permute.xlu1 %246  ;;  %v237_v10 = vpop.permute.xlu0 %236 }
  0xbe   : > { %v274_v19 = vmul.f32 %v237_v10, %v210_v11  ;;  %v275_v20 = vmul.f32 %v237_v10, %v211_v12  ;;  %v278_v25 = vmul.f32 %v247_v9, %v214_v15  ;;  %v279_v26 = vmul.f32 %v247_v9, %v215_v16 }
  0xbf   : > { %v325_v12 = vunpack.c.0.s8 %v324_v6 }
  0xc1   : > { %v252_v17 = vpop.permute.xlu1 %251  ;;  %v242_v18 = vpop.permute.xlu0 %241 }
  0xc2   : > { %v276_v21 = vmul.f32 %v242_v18, %v212_v13  ;;  %v277_v22 = vmul.f32 %v242_v18, %v213_v14  ;;  %v280_v33 = vmul.f32 %v252_v17, %v216_v23  ;;  %v281_v34 = vmul.f32 %v252_v17, %v217_v24 }
  0xc3   : > { %v327_v13 = vshrl.u32 %v326_v7, 7  ;;  %v317_v14 = vstv %s316_s7 }
  0xc4   : > { %v290_v27 = vadd.f32 %v276_v21, %v274_v19  ;;  %v303_v28 = vadd.f32 %v277_v22, %v275_v20 }
  0xc5   : > { %v262_v29 = vpop.permute.xlu1 %261  ;;  %v257_v30 = vpop.permute.xlu0 %256  ;;  %v328_v19 = vsub.s32 %v325_v12, %v327_v13 }
  0xc6   : > { %v291_v35 = vadd.f32 %v290_v27, %v278_v25  ;;  %v304_v36 = vadd.f32 %v303_v28, %v279_v26  ;;  %v282_v39 = vmul.f32 %v257_v30, %v218_v31  ;;  %v283_v40 = vmul.f32 %v257_v30, %v219_v32 }
  0xc7   : > { %v284_v46 = vmul.f32 %v262_v29, %v220_v37  ;;  %v285_v47 = vmul.f32 %v262_v29, %v221_v38 }
  0xc8   : > { %v292_v41 = vadd.f32 %v291_v35, %v280_v33  ;;  %v305_v42 = vadd.f32 %v304_v36, %v281_v34 }
  0xc9   : > { %v267_v43 = vpop.permute.xlu0 %266  ;;  %v272_v50 = vpop.permute.xlu1 %271 }
  0xca   : > { %v293_v48 = vadd.f32 %v292_v41, %v282_v39  ;;  %v306_v49 = vadd.f32 %v305_v42, %v283_v40  ;;  %v286_v53 = vmul.f32 %v267_v43, %v222_v44  ;;  %v287_v54 = vmul.f32 %v267_v43, %v223_v45 }
  0xcb   : > { %v288_v57 = vmul.f32 %v272_v50, %v224_v51  ;;  %v289_v58 = vmul.f32 %v272_v50, %v225_v52 }
  0xcc   : > { %v294_v55 = vadd.f32 %v293_v48, %v284_v46  ;;  %v307_v56 = vadd.f32 %v306_v49, %v285_v47 }
  0xce   : > { %v295_v59 = vadd.f32 %v294_v55, %v286_v53  ;;  %v308_v60 = vadd.f32 %v307_v56, %v287_v54 }
  0xd0   : > { %v296_v61 = vadd.f32 %v295_v59, %v288_v57  ;;  %v309_v62 = vadd.f32 %v308_v60, %v289_v58 }
  0xd2   : > { %v297_v63 = vrot.slane %v296_v61, 4  ;;  %v310_v0 = vrot.slane %v309_v62, 4 }
  0xd4   : > { %v298_v1 = vadd.f32 %v297_v63, %v296_v61  ;;  %v311_v2 = vadd.f32 %v310_v0, %v309_v62 }
  0xd6   : > { %v299_v3 = vrot.slane %v298_v1, 2  ;;  %v312_v4 = vrot.slane %v311_v2, 2 }
  0xd8   : > { %v300_v8 = vadd.f32 %v299_v3, %v298_v1  ;;  %v313_v9 = vadd.f32 %v312_v4, %v311_v2 }
  0xda   : > { %v301_v10 = vrot.slane %v300_v8, 1  ;;  %v314_v11 = vrot.slane %v313_v9, 1 }
  0xdc   : > { %v302_v15 = vadd.f32 %v301_v10, %v300_v8  ;;  %v315_v16 = vadd.f32 %v314_v11, %v313_v9 }
  0xde   : > { %v318_v17 = vadd.f32 %v317_v14, %v302_v15  ;;  %v319_v18 = vadd.f32 %v317_v14, %v315_v16 }
  0xe0   : > { %v322_v20 = vcombine.low %v318_v17, %v319_v18 }
  0xe2   : > { %v329_v21 = vrot.slane %v322_v20, %v328_v19 }
  0xe4   : > { %v336_v22 = vrot.slane %v329_v21, %v328_v19 }
  0xe6   : > { %342 = vst.msk [vmem:[%s207_s10] sm:$0x3] %vm340_vm0, %v336_v22 }
  0xe7   : > { %572 = shalt.err (!%p569_p5)
}
  0xe8   : > { %s573_s8 = scalar_lea.hbm %s839_s25, 32  ;;  %s577_s6 = scalar_lea.hbm %s891_s3, 64 }
  0xe9   : > { %p574_p4 = scmp.ne.s32.totalorder %s839_s25, %s573_s8  ;;  %p578_p12 = scmp.lt.u32.totalorder %s839_s25, %s891_s3 }
  0xea   : > { %p579_p1 = scmp.lt.u32.totalorder %s577_s6, %s573_s8  ;;  %p581_p8 = scmp.lt.u32.totalorder %s573_s8, %s839_s25 }
  0xeb   : > { %p575_p7 = pnand %p574_p4, %p899_p9 }
  0xec   : > { %p580_p3 = por %p579_p1, %p578_p12 }
  0xed   : > { %p576_p10 = pneg %p575_p7 }
  0xee   : > { %p582_p11 = por %p581_p8, %p580_p3 }
  0xf0   : > { %p583_p0 = pnand %p582_p11, %p576_p10 }
  0xf2   : > { %586 = shalt.err (!%p583_p0)
}
  0xf3   : > { %463 = dma.vmem_to_hbm [thread:$0]  (%p899_p9), %s841_s11, 32, %s839_s25, %s344_s23  }
  0xf4 PF: > { %s372_s7 = sand.u32 1, %s621_s14   ;;  %p900_p6 = scmp.ne.s32.totalorder %s896_s28, 0 }
  0xf5   : > { %p901_p13 = scmp.ge.s32.totalorder %s641_s19, 2  ;;  %s373_s1 = scalar_lea.sflag [#allocation5], %s372_s7 }
  0xf7   : > { %p470_p2 = pnand %p901_p13, %p900_p6 }
  0xf9   : > { %616 = dma.done.wait (!%p470_p2), %s373_s1, 32  }
  0xfa   : > { %618 = vsyncadd (!%p470_p2), %s373_s1, 4294967264  ;;  %s20_s19 = sadd.s32 1, %s641_s19   ;;  %s902_s14 = smov %s625_s15 }
  0xfb   : > { %p17_p5 = scmp.ge.s32.totalorder %s20_s19, 4   ;;  %s903_s15 = smov %s629_s16 }
  0xfc   : > { %s904_s16 = smov %s728_s27  ;;  %s905_s17 = smov %s637_s18 }
  0xfd   : > { %s906_s18 = smov %s908_s21  ;;  %19 = sbr.rel (!%p17_p5) target bundleno = 8 (0x8), region = 77 }
 0x104   :  { %378 = vsyncpa [#allocation4], 1 }
 0x105   :  { %380 = vsyncpa [#allocation4 + $0x1], 1 }
 0x106   :  { %381 = vsyncpa [#allocation5], 1 }
 0x107   :  { %383 = vsyncpa [#allocation5 + $0x1], 1 }

</bundles_post_ra>
